<compile_context>
chip_gen: v7x
topology: tpu7x:2x2x1
jax: 0.10.0
libtpu: 0.0.40
codegen_flags: <defaults>
</compile_context>

<pallas_src>
import jax
import jax.numpy as jnp
import numpy as np
from jax.experimental import pallas as pl
from jax.experimental.pallas import tpu as pltpu

TEMPERATURE = 64.0


def _round_up(x, m):
    return -(-x // m) * m


def _choose_batch_tile(B, P, C, itemsize, x_buffer_budget=6 << 20):
    """Rows of x per grid step: as many as a ~6 MiB-per-buffer VMEM budget allows."""
    # Per-row footprint of an x block in VMEM ((8, 128)-tiled layout padding).
    row_bytes = _round_up(P, 8) * _round_up(C, 128) * itemsize
    tb = int(max(1, min(B, x_buffer_budget // row_bytes)))
    # Keep >=2 grid steps (feeds both v7x TensorCores / enables pipelining) when
    # the input is big enough for that to matter; tiny problems collapse to 1 step.
    if tb == B and B > 1 and B * row_bytes > (4 << 20):
        tb = B // 2
    # Use an exact divisor of B so blocks tile the batch with no ragged remainder.
    while B % tb:
        tb -= 1
    return tb


def _estimate_vmem_bytes(TB, P, C, itemsize):
    c_pad = _round_up(C, 128)
    p_pad = _round_up(P, 8)
    x_tile = TB * p_pad * c_pad * itemsize      # double-buffered
    w_tile = p_pad * c_pad * itemsize           # count 2 buffers (conservative)
    o_tile = 8 * _round_up(TB * P, 128) * 4     # f32 output slab, double-buffered
    return 2 * x_tile + 2 * w_tile + 2 * o_tile


def _euc_kernel(w_ref, x_ref, o_ref):
    # w_ref: (P, C)     grid-invariant prototype weights
    # x_ref: (TB, P, C) TB batch rows
    # o_ref: (1, TB*P)  lane-dense slab (optimized) or (TB, P) (fallback)
    w = w_ref[...]
    x = x_ref[...]
    if x.dtype == jnp.bfloat16 and w.dtype == jnp.bfloat16:
        # v6e / v7x: bf16 is native on the VPU; keep the elementwise path in bf16
        # and accumulate the reduction in f32.  (Feed f32 inputs on v5e.)
        diff = x - w[None, :, :]
    else:
        diff = x.astype(jnp.float32) - w.astype(jnp.float32)[None, :, :]
    # Reduce over classes (lane axis) with f32 accumulation; 1/64 is exact in fp.
    scores = jnp.sum(diff * diff, axis=-1, dtype=jnp.float32) * (-1.0 / TEMPERATURE)
    o_ref[...] = scores.reshape(o_ref.shape).astype(o_ref.dtype)


def _build_forward(B, P, C, TB, *, lane_dense, single_buffer_weight, vmem_limit):
    nb = B // TB
    w_spec_kwargs = {}
    if single_buffer_weight:
        # Weight block is identical for every grid step: no need to double-buffer it.
        w_spec_kwargs["pipeline_mode"] = pl.Buffered(1)
    in_specs = [
        pl.BlockSpec((P, C), lambda i: (0, 0), **w_spec_kwargs),   # shared weight
        pl.BlockSpec((TB, P, C), lambda i: (i, 0, 0)),             # TB batch rows
    ]
    if lane_dense:
        out_shape = jax.ShapeDtypeStruct((nb, TB * P), jnp.float32)
        out_specs = pl.BlockSpec((1, TB * P), lambda i: (i, 0))
    else:
        out_shape = jax.ShapeDtypeStruct((B, P), jnp.float32)
        out_specs = pl.BlockSpec((TB, P), lambda i: (i, 0))
    return pl.pallas_call(
        _euc_kernel,
        out_shape=out_shape,
        grid=(nb,),
        in_specs=in_specs,
        out_specs=out_specs,
        compiler_params=pltpu.CompilerParams(
            dimension_semantics=("parallel",),
            vmem_limit_bytes=vmem_limit,
        ),
    )


def euc_classifier_forward(x, weight):
    """x: (B, P, C), weight: (P, C) -> scores (B, P) float32."""
    B, P, C = x.shape
    assert weight.shape == (P, C)
    itemsize = jnp.dtype(x.dtype).itemsize
    TB = _choose_batch_tile(B, P, C, itemsize)
    vmem_limit = int(min(48 << 20,
                         max(16 << 20, 2 * _estimate_vmem_bytes(TB, P, C, itemsize))))
    # TODO(synk): for production-scale outplanes also tile P (and fold a small C
    # into lanes) — the full-(P, C) weight block here assumes P*round_up(C,128)*4
    # bytes fits comfortably in VMEM.
    try:
        out = _build_forward(B, P, C, TB, lane_dense=True,
                             single_buffer_weight=True,
                             vmem_limit=vmem_limit)(weight, x)
    except Exception:
        # Conservative fallback if this JAX/Mosaic build rejects
        # pipeline_mode=pl.Buffered(1) or the in-kernel lane-packing reshape.
        out = _build_forward(B, P, C, TB, lane_dense=False,
                             single_buffer_weight=False,
                             vmem_limit=vmem_limit)(weight, x)
    return out.reshape(B, P)


if __name__ == "__main__":
    # Small shapes consistent with the module: outplanes=8, num_classes=16, batch=2.
    B, outplanes, num_classes = 2, 8, 16

    key = jax.random.PRNGKey(0)
    k_w, k_x = jax.random.split(key)

    # Deterministic parameter init matching __init__:
    #   weight ~ Normal(0, sqrt(2 / num_classes)), shape (outplanes, num_classes)
    #   scale = 10.0 exists in the module but is unused in forward.
    weight = (jax.random.normal(k_w, (outplanes, num_classes), jnp.float32)
              * np.sqrt(2.0 / num_classes))
    scale = jnp.float32(10.0)  # unused in forward, kept for parity with the module

    x = jax.random.normal(k_x, (B, outplanes, num_classes), jnp.float32)

    scores = euc_classifier_forward(x, weight)
    scores = jax.block_until_ready(scores)

    # Pure-JAX reference.
    ref = -jnp.sum((weight[None, :, :] - x) ** 2, axis=2) / TEMPERATURE
    np.testing.assert_allclose(np.asarray(scores), np.asarray(ref),
                               rtol=1e-5, atol=1e-5)

    print("KERNEL_OK")
</pallas_src>

<mosaic_0001>
module attributes {stable_mosaic.version = 11 : i64} {
  func.func @_euc_kernel(%arg0: i32, %arg1: memref<8x16xf32, #tpu.memory_space<vmem>>, %arg2: memref<2x8x16xf32, #tpu.memory_space<vmem>>, %arg3: memref<1x16xf32, #tpu.memory_space<vmem>>) attributes {dimension_semantics = [#tpu.dimension_semantics<parallel>], iteration_bounds = array<i64: 1>, scalar_prefetch = 0 : i64, scratch_operands = 0 : i64, tpu.core_type = #tpu.core_type<tc>, window_params = [{pipeline_mode = #tpu.pipeline_mode<synchronous>, transform_indices = @transform_0, window_bounds = array<i64: 8, 16>}, {transform_indices = @transform_1, window_bounds = array<i64: 2, 8, 16>}, {transform_indices = @transform_2, window_bounds = array<i64: 1, 16>}]} {
    %c0 = arith.constant 0 : index
    %c0_0 = arith.constant 0 : index
    %0 = vector.load %arg1[%c0, %c0_0] : memref<8x16xf32, #tpu.memory_space<vmem>>, vector<8x16xf32>
    %c0_1 = arith.constant 0 : index
    %c0_2 = arith.constant 0 : index
    %c0_3 = arith.constant 0 : index
    %1 = vector.load %arg2[%c0_1, %c0_2, %c0_3] : memref<2x8x16xf32, #tpu.memory_space<vmem>>, vector<2x8x16xf32>
    %2 = vector.shape_cast %0 : vector<8x16xf32> to vector<1x8x16xf32>
    %3 = vector.broadcast %2 : vector<1x8x16xf32> to vector<2x8x16xf32>
    %4 = arith.subf %1, %3 : vector<2x8x16xf32>
    %5 = arith.mulf %4, %4 : vector<2x8x16xf32>
    %cst = arith.constant dense<0.000000e+00> : vector<2x8xf32>
    %6 = vector.multi_reduction <add>, %5, %cst [2] : vector<2x8x16xf32> to vector<2x8xf32>
    %cst_4 = arith.constant -1.562500e-02 : f32
    %7 = vector.broadcast %cst_4 : f32 to vector<2x8xf32>
    %8 = arith.mulf %6, %7 : vector<2x8xf32>
    %9 = vector.shape_cast %8 : vector<2x8xf32> to vector<1x16xf32>
    %c0_5 = arith.constant 0 : index
    %c0_6 = arith.constant 0 : index
    %10 = vector.load %arg3[%c0_5, %c0_6] : memref<1x16xf32, #tpu.memory_space<vmem>>, vector<1x16xf32>
    tpu.vector_store %arg3[%c0_5, %c0_6], %9 {strides = array<i32>} : memref<1x16xf32, #tpu.memory_space<vmem>>, vector<1x16xf32>,
    return
  }
  func.func @transform_0(%arg0: i32) -> (i32, i32) {
    %c0_i32 = arith.constant 0 : i32
    %c0_i32_0 = arith.constant 0 : i32
    %c0_i32_1 = arith.constant 0 : i32
    return %c0_i32, %c0_i32_0 : i32, i32
  }
  func.func @transform_1(%arg0: i32) -> (i32, i32, i32) {
    %c0_i32 = arith.constant 0 : i32
    %c0_i32_0 = arith.constant 0 : i32
    %c0_i32_1 = arith.constant 0 : i32
    return %arg0, %c0_i32, %c0_i32_0 : i32, i32, i32
  }
  func.func @transform_2(%arg0: i32) -> (i32, i32) {
    %c0_i32 = arith.constant 0 : i32
    %c0_i32_0 = arith.constant 0 : i32
    return %arg0, %c0_i32 : i32, i32
  }
}

module attributes {stable_mosaic.version = 11 : i64} {
  func.func @_euc_kernel(%arg0: i32, %arg1: memref<8x16xf32, #tpu.memory_space<vmem>>, %arg2: memref<2x8x16xf32, #tpu.memory_space<vmem>>, %arg3: memref<2x8xf32, #tpu.memory_space<vmem>>) attributes {dimension_semantics = [#tpu.dimension_semantics<parallel>], iteration_bounds = array<i64: 1>, scalar_prefetch = 0 : i64, scratch_operands = 0 : i64, tpu.core_type = #tpu.core_type<tc>, window_params = [{pipeline_mode = #tpu.pipeline_mode<synchronous>, transform_indices = @transform_0, window_bounds = array<i64: 8, 16>}, {transform_indices = @transform_1, window_bounds = array<i64: 2, 8, 16>}, {transform_indices = @transform_2, window_bounds = array<i64: 2, 8>}]} {
    %c0 = arith.constant 0 : index
    %c0_0 = arith.constant 0 : index
    %0 = vector.load %arg1[%c0, %c0_0] : memref<8x16xf32, #tpu.memory_space<vmem>>, vector<8x16xf32>
    %c0_1 = arith.constant 0 : index
    %c0_2 = arith.constant 0 : index
    %c0_3 = arith.constant 0 : index
    %1 = vector.load %arg2[%c0_1, %c0_2, %c0_3] : memref<2x8x16xf32, #tpu.memory_space<vmem>>, vector<2x8x16xf32>
    %2 = vector.shape_cast %0 : vector<8x16xf32> to vector<1x8x16xf32>
    %3 = vector.broadcast %2 : vector<1x8x16xf32> to vector<2x8x16xf32>
    %4 = arith.subf %1, %3 : vector<2x8x16xf32>
    %5 = arith.mulf %4, %4 : vector<2x8x16xf32>
    %cst = arith.constant dense<0.000000e+00> : vector<2x8xf32>
    %6 = vector.multi_reduction <add>, %5, %cst [2] : vector<2x8x16xf32> to vector<2x8xf32>
    %cst_4 = arith.constant -1.562500e-02 : f32
    %7 = vector.broadcast %cst_4 : f32 to vector<2x8xf32>
    %8 = arith.mulf %6, %7 : vector<2x8xf32>
    %c0_5 = arith.constant 0 : index
    %c0_6 = arith.constant 0 : index
    %9 = vector.load %arg3[%c0_5, %c0_6] : memref<2x8xf32, #tpu.memory_space<vmem>>, vector<2x8xf32>
    tpu.vector_store %arg3[%c0_5, %c0_6], %8 {strides = array<i32>} : memref<2x8xf32, #tpu.memory_space<vmem>>, vector<2x8xf32>,
    return
  }
  func.func @transform_0(%arg0: i32) -> (i32, i32) {
    %c0_i32 = arith.constant 0 : i32
    %c0_i32_0 = arith.constant 0 : i32
    %c0_i32_1 = arith.constant 0 : i32
    return %c0_i32, %c0_i32_0 : i32, i32
  }
  func.func @transform_1(%arg0: i32) -> (i32, i32, i32) {
    %c0_i32 = arith.constant 0 : i32
    %c0_i32_0 = arith.constant 0 : i32
    %c0_i32_1 = arith.constant 0 : i32
    return %arg0, %c0_i32, %c0_i32_0 : i32, i32, i32
  }
  func.func @transform_2(%arg0: i32) -> (i32, i32) {
    %c0_i32 = arith.constant 0 : i32
    %c0_i32_0 = arith.constant 0 : i32
    return %arg0, %c0_i32 : i32, i32
  }
}

</mosaic_0001>

<bundles_post_ra>
// kernel: tpu_custom_call.1
= control target key start
LH: loop header
LB: loop body
LE: loop exit
PB: predicated region body
PF: predicated region fallthrough
CT: control target
= control target key end

     0   :  { %7 = vsyncpa [#allocation3], 0  ;;  %s228_s0 = inlined_call_operand.hbm [shape: f32[8,16], index: 0, kind: input, shape index: {}]   ;;  %s229_s1 = inlined_call_operand.hbm [shape: f32[2,8,16], index: 1, kind: input, shape index: {}]   ;;  %s230_s2 = inlined_call_operand.hbm [shape: f32[1,16], index: 2, kind: output, shape index: {}]  }
   0x1   :  { %8 = vsyncpa [#allocation6], 0 }
   0x2   :  { %9 = vsyncpa [#allocation4], 0  ;;  %s165_s9 = smov [#allocation2]   ;;  %s166_s11 = smov [#allocation5]  }
   0x3   :  { %s16_s10 = sshll.u32 %s165_s9, 4  ;;  %s25_s12 = sshll.u32 %s166_s11, 4  ;;  %s17_s10 = int_to_ptr.vmem [resolvable:$true] %s16_s10  ;;  %s185_s12 = int_to_ptr.vmem [resolvable:$true] %s25_s12 }
   0x4   :  { %s93_s15 = scalar_lea.hbm %s228_s0, 128 }
   0x5   :  { %p94_p0 = scmp.ne.s32.totalorder %s228_s0, %s93_s15  ;;  %p97_p1 = scmp.lt.u32.totalorder %s93_s15, %s228_s0 }
   0x7   :  { %p99_p2 = pnand %p97_p1, %p94_p0 }
   0x9   :  { %102 = shalt.err (!%p99_p2)
}
   0xa   :  { %s103_s20 = scalar_lea.vmem %s17_s10, 128  ;;  %p108_p4 = scmp.lt.s32.totalorder %s17_s10, %s17_s10 }
   0xb   :  { %p104_p3 = scmp.ne.s32.totalorder %s17_s10, %s103_s20  ;;  %p109_p5 = scmp.lt.s32.totalorder %s103_s20, %s103_s20 }
   0xd   :  { %p110_p6 = por %p109_p5, %p108_p4 }
   0xf   :  { %p111_p7 = pnand %p110_p6, %p104_p3 }
  0x11   :  { %114 = shalt.err (!%p111_p7)
}
  0x12   :  { %19 = dma.hbm_to_vmem [thread:$0]  %s228_s0, 128, %s17_s10, [#allocation3]  }
  0x13   :  { %s115_s25 = scalar_lea.hbm %s229_s1, 256 }
  0x14   :  { %p116_p8 = scmp.ne.s32.totalorder %s229_s1, %s115_s25  ;;  %p119_p9 = scmp.lt.u32.totalorder %s115_s25, %s229_s1 }
  0x16   :  { %p121_p10 = pnand %p119_p9, %p116_p8 }
  0x18   :  { %124 = shalt.err (!%p121_p10)
}
  0x19   :  { %s125_s30 = scalar_lea.vmem %s185_s12, 256  ;;  %p130_p12 = scmp.lt.s32.totalorder %s185_s12, %s185_s12 }
  0x1a   :  { %p126_p11 = scmp.ne.s32.totalorder %s185_s12, %s125_s30  ;;  %p131_p13 = scmp.lt.s32.totalorder %s125_s30, %s125_s30 }
  0x1c   :  { %p132_p0 = por %p131_p13, %p130_p12 }
  0x1e   :  { %p133_p1 = pnand %p132_p0, %p126_p11 }
  0x20   :  { %136 = shalt.err (!%p133_p1)
}
  0x21   :  { %s167_s0 = smov 128   ;;  %s168_s3 = smov 8  }
  0x22   :  { %31 = dma.hbm_to_vmem [thread:$0]  %s229_s1, 256, %s185_s12, [#allocation6], %s167_s0, %s167_s0, %s168_s3  }
  0x23   :  { %159 = dma.done.wait [#allocation3], 128  }
  0x24   :  { %160 = vsyncadd [#allocation3], 4294967168 }
  0x25   :  { %161 = dma.done.wait [#allocation6], 256  }
  0x26   :  { %162 = vsyncadd [#allocation6], 4294967040  ;;  %v38_v0 = vld [vmem:[#allocation2] sm:$0xff]  ;;  %v39_v1 = vld [vmem:[#allocation5] sm:$0xff]  ;;  %vm45_vm0 = vcmask 130048   ;;  %v56_v9 = vlaneseq  ;;  %s169_s1 = smov [#allocation7]  }
  0x27   :  { %v40_v2 = vld [vmem:[#allocation5 + $0x8] sm:$0xff]  ;;  %v41_v3 = vsub.f32 %v39_v1, %v38_v0  ;;  %s78_s6 = sshll.u32 %s169_s1, 4  ;;  %vm67_vm1 = vcmask 130112   ;;  %vm70_vm2 = vcmask 122880   ;;  %s79_s6 = int_to_ptr.vmem [resolvable:$true] %s78_s6 }
  0x28   :  { %v42_v4 = vsub.f32 %v40_v2, %v38_v0  ;;  %v57_v10 = vand.u32 127, %v56_v9  ;;  %v59_v11 = vshrl.u32 %v56_v9, 7  ;;  %s137_s7 = scalar_lea.vmem %s79_s6, 16  ;;  %s141_s8 = scalar_lea.vmem %s79_s6, 32 }
  0x29   :  { %v43_v5 = vmul.f32 %v41_v3, %v41_v3  ;;  %p138_p2 = scmp.ne.s32.totalorder %s79_s6, %s137_s7  ;;  %p142_p3 = scmp.lt.s32.totalorder %s79_s6, %s79_s6 }
  0x2a   :  { %v44_v6 = vmul.f32 %v42_v4, %v42_v4  ;;  %v62_v12 = vadd.s32 4294967288, %v57_v10  ;;  %v60_v14 = vsub.s32 %v57_v10, %v59_v11  ;;  %p143_p4 = scmp.lt.s32.totalorder %s141_s8, %s137_s7 }
  0x2b   :  { %v46_v7 = vsel %vm45_vm0, %v43_v5, 0.0 }
  0x2c   :  { %47 = vadd.xlane.f32.xlu0 %v46_v7  ;;  %v49_v8 = vsel %vm45_vm0, %v44_v6, 0.0  ;;  %v65_v16 = vsub.s32 %v62_v12, %v59_v11  ;;  %p144_p5 = por %p143_p4, %p142_p3 }
  0x2e   :  { %p145_p6 = pnand %p144_p5, %p138_p2 }
  0x30   :  { %50 = vadd.xlane.f32.xlu0 %v49_v8 }
  0xb9   :  { %v48_v13 = vpop.xlane.xlu0 %47 }
  0xba   :  { %v52_v15 = vmul.f32 -0.015625, %v48_v13 }
  0xbc   :  { %v61_v19 = vrot.slane %v52_v15, %v60_v14 }
  0xbd   :  { %v51_v17 = vpop.xlane.xlu0 %50 }
  0xbe   :  { %v53_v18 = vmul.f32 -0.015625, %v51_v17 }
  0xc0   :  { %v66_v20 = vrot.slane %v53_v18, %v65_v16 }
  0xc2   :  { %v68_v21 = vsel %vm67_vm1, %v66_v20, %v61_v19 }
  0xc3   :  { %71 = vst.msk [vmem:[#allocation7] sm:$0x1] %vm70_vm2, %v68_v21 }
  0xc4   :  { %148 = shalt.err (!%p145_p6)
}
  0xc5   :  { %s149_s11 = scalar_lea.hbm %s230_s2, 16 }
  0xc6   :  { %p150_p7 = scmp.ne.s32.totalorder %s230_s2, %s149_s11  ;;  %p153_p8 = scmp.lt.u32.totalorder %s149_s11, %s230_s2 }
  0xc8   :  { %p155_p9 = pnand %p153_p8, %p150_p7 }
  0xca   :  { %158 = shalt.err (!%p155_p9)
}
  0xcb   :  { %81 = dma.vmem_to_hbm [thread:$0]  %s79_s6, 16, %s230_s2, [#allocation4]  }
  0xcc   :  { %163 = dma.done.wait [#allocation4], 16  }
  0xcd   :  { %164 = vsyncadd [#allocation4], 4294967280 }
  0xce   :  { %85 = vsyncpa [#allocation3], 1 }
  0xcf   :  { %86 = vsyncpa [#allocation6], 1 }
  0xd0   :  { %87 = vsyncpa [#allocation4], 1 }

// kernel: tpu_custom_call.1
= control target key start
LH: loop header
LB: loop body
LE: loop exit
PB: predicated region body
PF: predicated region fallthrough
CT: control target
= control target key end

     0   :  { %7 = vsyncpa [#allocation3], 0  ;;  %s227_s0 = inlined_call_operand.hbm [shape: f32[8,16], index: 0, kind: input, shape index: {}]   ;;  %s228_s1 = inlined_call_operand.hbm [shape: f32[2,8,16], index: 1, kind: input, shape index: {}]   ;;  %s229_s2 = inlined_call_operand.hbm [shape: f32[2,8], index: 2, kind: output, shape index: {}]  }
   0x1   :  { %8 = vsyncpa [#allocation6], 0 }
   0x2   :  { %9 = vsyncpa [#allocation4], 0  ;;  %s164_s9 = smov [#allocation2]   ;;  %s165_s11 = smov [#allocation5]  }
   0x3   :  { %s16_s10 = sshll.u32 %s164_s9, 4  ;;  %s25_s12 = sshll.u32 %s165_s11, 4  ;;  %s17_s10 = int_to_ptr.vmem [resolvable:$true] %s16_s10  ;;  %s184_s12 = int_to_ptr.vmem [resolvable:$true] %s25_s12 }
   0x4   :  { %s92_s15 = scalar_lea.hbm %s227_s0, 128 }
   0x5   :  { %p93_p0 = scmp.ne.s32.totalorder %s227_s0, %s92_s15  ;;  %p96_p1 = scmp.lt.u32.totalorder %s92_s15, %s227_s0 }
   0x7   :  { %p98_p2 = pnand %p96_p1, %p93_p0 }
   0x9   :  { %101 = shalt.err (!%p98_p2)
}
   0xa   :  { %s102_s20 = scalar_lea.vmem %s17_s10, 128  ;;  %p107_p4 = scmp.lt.s32.totalorder %s17_s10, %s17_s10 }
   0xb   :  { %p103_p3 = scmp.ne.s32.totalorder %s17_s10, %s102_s20  ;;  %p108_p5 = scmp.lt.s32.totalorder %s102_s20, %s102_s20 }
   0xd   :  { %p109_p6 = por %p108_p5, %p107_p4 }
   0xf   :  { %p110_p7 = pnand %p109_p6, %p103_p3 }
  0x11   :  { %113 = shalt.err (!%p110_p7)
}
  0x12   :  { %19 = dma.hbm_to_vmem [thread:$0]  %s227_s0, 128, %s17_s10, [#allocation3]  }
  0x13   :  { %s114_s25 = scalar_lea.hbm %s228_s1, 256 }
  0x14   :  { %p115_p8 = scmp.ne.s32.totalorder %s228_s1, %s114_s25  ;;  %p118_p9 = scmp.lt.u32.totalorder %s114_s25, %s228_s1 }
  0x16   :  { %p120_p10 = pnand %p118_p9, %p115_p8 }
  0x18   :  { %123 = shalt.err (!%p120_p10)
}
  0x19   :  { %s124_s30 = scalar_lea.vmem %s184_s12, 256  ;;  %p129_p12 = scmp.lt.s32.totalorder %s184_s12, %s184_s12 }
  0x1a   :  { %p125_p11 = scmp.ne.s32.totalorder %s184_s12, %s124_s30  ;;  %p130_p13 = scmp.lt.s32.totalorder %s124_s30, %s124_s30 }
  0x1c   :  { %p131_p0 = por %p130_p13, %p129_p12 }
  0x1e   :  { %p132_p1 = pnand %p131_p0, %p125_p11 }
  0x20   :  { %135 = shalt.err (!%p132_p1)
}
  0x21   :  { %s166_s0 = smov 128   ;;  %s167_s3 = smov 8  }
  0x22   :  { %31 = dma.hbm_to_vmem [thread:$0]  %s228_s1, 256, %s184_s12, [#allocation6], %s166_s0, %s166_s0, %s167_s3  }
  0x23   :  { %158 = dma.done.wait [#allocation3], 128  }
  0x24   :  { %159 = vsyncadd [#allocation3], 4294967168 }
  0x25   :  { %160 = dma.done.wait [#allocation6], 256  }
  0x26   :  { %161 = vsyncadd [#allocation6], 4294967040  ;;  %v38_v0 = vld [vmem:[#allocation2] sm:$0xff]  ;;  %v39_v1 = vld [vmem:[#allocation5] sm:$0xff]  ;;  %vm45_vm0 = vcmask 130048   ;;  %v56_v9 = vlaneseq  ;;  %s168_s1 = smov [#allocation7]  }
  0x27   :  { %v40_v2 = vld [vmem:[#allocation5 + $0x8] sm:$0xff]  ;;  %v41_v3 = vsub.f32 %v39_v1, %v38_v0  ;;  %s77_s6 = sshll.u32 %s168_s1, 4  ;;  %vm66_vm1 = vcmask 1041409   ;;  %vm69_vm2 = vcmask 58368   ;;  %s78_s6 = int_to_ptr.vmem [resolvable:$true] %s77_s6 }
  0x28   :  { %v42_v4 = vsub.f32 %v40_v2, %v38_v0  ;;  %v57_v10 = vand.u32 127, %v56_v9  ;;  %v59_v11 = vshrl.u32 %v56_v9, 7  ;;  %s136_s7 = scalar_lea.vmem %s78_s6, 32  ;;  %p141_p3 = scmp.lt.s32.totalorder %s78_s6, %s78_s6 }
  0x29   :  { %v43_v5 = vmul.f32 %v41_v3, %v41_v3  ;;  %p137_p2 = scmp.ne.s32.totalorder %s78_s6, %s136_s7  ;;  %p142_p4 = scmp.lt.s32.totalorder %s136_s7, %s136_s7 }
  0x2a   :  { %v44_v6 = vmul.f32 %v42_v4, %v42_v4  ;;  %v60_v13 = vsub.s32 %v57_v10, %v59_v11 }
  0x2b   :  { %v46_v7 = vsel %vm45_vm0, %v43_v5, 0.0  ;;  %p143_p5 = por %p142_p4, %p141_p3 }
  0x2c   :  { %47 = vadd.xlane.f32.xlu0 %v46_v7  ;;  %v49_v8 = vsel %vm45_vm0, %v44_v6, 0.0 }
  0x2d   :  { %p144_p6 = pnand %p143_p5, %p137_p2 }
  0x30   :  { %50 = vadd.xlane.f32.xlu0 %v49_v8 }
  0xb9   :  { %v48_v12 = vpop.xlane.xlu0 %47 }
  0xba   :  { %v52_v14 = vmul.f32 -0.015625, %v48_v12 }
  0xbc   :  { %v61_v17 = vrot.slane %v52_v14, %v60_v13 }
  0xbd   :  { %v51_v15 = vpop.xlane.xlu0 %50 }
  0xbe   :  { %v53_v16 = vmul.f32 -0.015625, %v51_v15 }
  0xc0   :  { %v65_v18 = vrot.slane %v53_v16, %v60_v13 }
  0xc2   :  { %v67_v19 = vsel %vm66_vm1, %v65_v18, %v61_v17 }
  0xc3   :  { %70 = vst.msk [vmem:[#allocation7] sm:$0x3] %vm69_vm2, %v67_v19 }
  0xc4   :  { %147 = shalt.err (!%p144_p6)
}
  0xc5   :  { %s148_s10 = scalar_lea.hbm %s229_s2, 32 }
  0xc6   :  { %p149_p7 = scmp.ne.s32.totalorder %s229_s2, %s148_s10  ;;  %p152_p8 = scmp.lt.u32.totalorder %s148_s10, %s229_s2 }
  0xc8   :  { %p154_p9 = pnand %p152_p8, %p149_p7 }
  0xca   :  { %157 = shalt.err (!%p154_p9)
}
  0xcb   :  { %80 = dma.vmem_to_hbm [thread:$0]  %s78_s6, 32, %s229_s2, [#allocation4]  }
  0xcc   :  { %162 = dma.done.wait [#allocation4], 32  }
  0xcd   :  { %163 = vsyncadd [#allocation4], 4294967264 }
  0xce   :  { %84 = vsyncpa [#allocation3], 1 }
  0xcf   :  { %85 = vsyncpa [#allocation6], 1 }
  0xd0   :  { %86 = vsyncpa [#allocation4], 1 }

</bundles_post_ra>
